<compile_context>
chip_gen: v6e
topology: v6e:2x2x1
jax: 0.10.0
libtpu: 0.0.40
codegen_flags: <defaults>
</compile_context>

<pallas_src>
import functools

import jax
import jax.numpy as jnp
from jax import lax
from jax.experimental import pallas as pl
from jax.experimental.pallas import tpu as pltpu


def _round_up(a, m):
    return ((a + m - 1) // m) * m


# ---------------------------------------------------------------------------
# Pass 1: input projections for both directions (pipelined GEMMs)
# ---------------------------------------------------------------------------
def _inproj_kernel(x_ref, wi_ref, gx_ref):
    tc, Bp, Din = x_ref.shape
    H4 = wi_ref.shape[2]
    x2 = x_ref[...].reshape(tc * Bp, Din)                      # bf16
    gf = jnp.dot(x2, wi_ref[0], preferred_element_type=jnp.float32)
    gb = jnp.dot(x2, wi_ref[1], preferred_element_type=jnp.float32)
    # Store bf16: halves HBM traffic of the (T,B,8H)-sized intermediate.
    gx_ref[0] = gf.astype(jnp.bfloat16).reshape(tc, Bp, H4)
    gx_ref[1] = gb.astype(jnp.bfloat16).reshape(tc, Bp, H4)


# ---------------------------------------------------------------------------
# Pass 2: per-direction recurrence, streamed over time chunks
# ---------------------------------------------------------------------------
def _recurrent_kernel(gx_ref, lens_ref, wh_ref, b_ref, out_ref, h_ref, c_ref,
                      *, unroll):
    d = pl.program_id(0)            # 0 = forward, 1 = backward
    i = pl.program_id(1)            # time-chunk index (sequential recurrence)
    nT = pl.num_programs(1)
    tc, Bp, H4 = gx_ref.shape
    H = H4 // 4

    @pl.when(i == 0)
    def _():                        # fresh state at the start of each direction
        h_ref[...] = jnp.zeros_like(h_ref)
        c_ref[...] = jnp.zeros_like(c_ref)

    wh = wh_ref[...]                # (H, 4H) bf16, per-direction (no zero half)
    b = b_ref[...]                  # (1, 4H) f32 bias (kept in f32)
    lens = lens_ref[...]            # (Bp, 1) int32

    # Absolute start time of this chunk (fwd chunks ascend, bwd descend).
    t0 = ((1 - d) * i + d * (nT - 1 - i)) * tc

    def step(j, carry):
        h, c = carry                # (Bp, H) f32 — state carried in f32
        # Forward walks the chunk front-to-back, backward back-to-front.
        local = (1 - d) * j + d * (tc - 1 - j)
        tau = t0 + local            # absolute timestep being processed

        gx = gx_ref[local].astype(jnp.float32)                 # (Bp, 4H)
        g = jnp.dot(h.astype(jnp.bfloat16), wh,
                    preferred_element_type=jnp.float32) + gx + b

        # Gate math stays f32 (v5e has no bf16 VPU/EUP; EUP is the binding unit).
        i_g = jax.nn.sigmoid(g[:, 0 * H:1 * H])
        f_g = jax.nn.sigmoid(g[:, 1 * H:2 * H])
        g_g = jnp.tanh(      g[:, 2 * H:3 * H])
        o_g = jax.nn.sigmoid(g[:, 3 * H:4 * H])

        c_new = f_g * c + i_g * g_g
        h_new = o_g * jnp.tanh(c_new)

        valid = lens > tau                                     # packed-seq mask
        h = jnp.where(valid, h_new, h)
        c = jnp.where(valid, c_new, c)
        # NOTE: this store is lane-dense when H is a multiple of 128.
        out_ref[local] = jnp.where(valid, h_new, 0.0)
        return h, c

    h_fin, c_fin = lax.fori_loop(0, tc, step, (h_ref[...], c_ref[...]),
                                 unroll=unroll)
    h_ref[...] = h_fin
    c_ref[...] = c_fin


# ---------------------------------------------------------------------------
# Wrapper
# ---------------------------------------------------------------------------
def _choose_time_chunk(T, Bp, H):
    # Enough GEMM rows (tc*Bp >= 256) for pass-1 MXU utilization, ~<=2 MiB
    # bf16 gx block per pipelined buffer, and no gross over-padding of tiny T.
    tc = max(16, -(-256 // Bp))
    cap = max(8, (2 * 1024 * 1024) // max(1, Bp * 4 * H * 2))
    tc = min(tc, cap)
    tc = min(tc, _round_up(max(T, 1), 8))
    return max(tc, 1)


def bilstm_forward(x, lens, kp):
    """x: (T, B, Din) f32 time-major padded, lens: (B,) int32.
    Returns (T, B, 2H) f32 (zeros at t >= lens[b])."""
    T, B, _ = x.shape
    H = kp["wh"].shape[1]
    H4 = 4 * H

    # Pad batch to sublane granularity; padded rows get lens=0 -> zeros.
    Bp = max(8, _round_up(B, 8))
    tc = _choose_time_chunk(T, Bp, H)
    T_pad = _round_up(T, tc)
    nT = T_pad // tc

    x = jnp.pad(x, ((0, T_pad - T), (0, Bp - B), (0, 0))).astype(jnp.bfloat16)
    lens2 = jnp.pad(lens.astype(jnp.int32), (0, Bp - B)).reshape(Bp, 1)

    # ---- Pass 1: bf16 input projections for both directions ----
    gx = pl.pallas_call(
        _inproj_kernel,
        out_shape=jax.ShapeDtypeStruct((2, T_pad, Bp, H4), jnp.bfloat16),
        grid=(nT,),
        in_specs=[
            pl.BlockSpec((tc, Bp, x.shape[2]), lambda i: (i, 0, 0)),
            pl.BlockSpec((2, x.shape[2], H4), lambda i: (0, 0, 0)),
        ],
        out_specs=pl.BlockSpec((2, tc, Bp, H4), lambda i: (0, i, 0, 0)),
        compiler_params=pltpu.CompilerParams(
            dimension_semantics=("parallel",)),
    )(x, kp["wi"])

    # ---- Pass 2: streamed bidirectional recurrence ----
    # Forward (d=0) chunks walk i ascending; backward (d=1) chunks descend.
    tmap = lambda d, i: (1 - d) * i + d * (nT - 1 - i)
    # Deeper unroll only when the per-step gate temp is small (avoid spills).
    unroll = 2 if (Bp * H4 * 4) <= (64 * 1024) else 1
    # TODO(synk): bigger structural option — fuse pass 1 into pass 2 (compute
    # chunk n+1's input-projection GEMM while the recurrence runs chunk n) to
    # eliminate the gx HBM round-trip entirely.
    out2 = pl.pallas_call(
        functools.partial(_recurrent_kernel, unroll=unroll),
        out_shape=jax.ShapeDtypeStruct((2, T_pad, Bp, H), jnp.float32),
        grid=(2, nT),
        in_specs=[
            pl.BlockSpec((None, tc, Bp, H4), lambda d, i: (d, tmap(d, i), 0, 0)),
            pl.BlockSpec((Bp, 1), lambda d, i: (0, 0)),
            pl.BlockSpec((None, H, H4), lambda d, i: (d, 0, 0)),
            pl.BlockSpec((None, 1, H4), lambda d, i: (d, 0, 0)),
        ],
        out_specs=pl.BlockSpec((None, tc, Bp, H),
                               lambda d, i: (d, tmap(d, i), 0, 0)),
        scratch_shapes=[pltpu.VMEM((Bp, H), jnp.float32),
                        pltpu.VMEM((Bp, H), jnp.float32)],
        compiler_params=pltpu.CompilerParams(
            dimension_semantics=("parallel", "arbitrary")),
    )(gx, lens2, kp["wh"], kp["b"])

    # Merge the direction-major halves into (T, B, 2H).
    return jnp.concatenate([out2[0, :T, :B], out2[1, :T, :B]], axis=-1)


# ---------------------------------------------------------------------------
# Parameters (torch layout) and packing to the kernel layout
# ---------------------------------------------------------------------------
def init_bilstm_params(key, inp_size, out_size):
    """torch.nn.LSTM-shaped params: weight_ih (4H, Din), weight_hh (4H, H),
    biases (4H,), per direction, uniform(-k, k) with k = 1/sqrt(H)."""
    assert out_size % 2 == 0, "Output size has to be even"
    H = out_size // 2
    k = 1.0 / jnp.sqrt(H)
    keys = jax.random.split(key, 8)

    def u(kk, shape):
        return jax.random.uniform(kk, shape, jnp.float32, -k, k)

    return {
        "w_ih_f": u(keys[0], (4 * H, inp_size)),
        "w_hh_f": u(keys[1], (4 * H, H)),
        "b_ih_f": u(keys[2], (4 * H,)),
        "b_hh_f": u(keys[3], (4 * H,)),
        "w_ih_b": u(keys[4], (4 * H, inp_size)),
        "w_hh_b": u(keys[5], (4 * H, H)),
        "b_ih_b": u(keys[6], (4 * H,)),
        "b_hh_b": u(keys[7], (4 * H,)),
    }


def pack_bilstm_params(raw):
    """Kernel layout (PyTorch gate order i, f, g, o kept within 4H columns):
       wi: (2, Din, 4H) bf16  per-direction input weights
       wh: (2, H,   4H) bf16  per-direction recurrent weights
       b:  (2, 1,   4H) f32   per-direction combined bias (added in f32)"""
    wi = jnp.stack([raw["w_ih_f"].T, raw["w_ih_b"].T]).astype(jnp.bfloat16)
    wh = jnp.stack([raw["w_hh_f"].T, raw["w_hh_b"].T]).astype(jnp.bfloat16)
    b = jnp.stack([(raw["b_ih_f"] + raw["b_hh_f"])[None, :],
                   (raw["b_ih_b"] + raw["b_hh_b"])[None, :]]).astype(jnp.float32)
    return {"wi": wi, "wh": wh, "b": b}


# ---------------------------------------------------------------------------
# Pure-JAX f32 reference (torch-layout params) for correctness checking
# ---------------------------------------------------------------------------
def bilstm_reference(x, lens, raw):
    T, B, _ = x.shape
    H = raw["w_hh_f"].shape[1]
    lens2 = lens.reshape(B, 1)

    def make_step(w_ih, w_hh, b):
        wi, wh = w_ih.T, w_hh.T

        def step(carry, inp):
            h, c = carry
            x_t, t = inp
            g = x_t @ wi + h @ wh + b
            i_g = jax.nn.sigmoid(g[:, 0:H])
            f_g = jax.nn.sigmoid(g[:, H:2 * H])
            g_g = jnp.tanh(g[:, 2 * H:3 * H])
            o_g = jax.nn.sigmoid(g[:, 3 * H:4 * H])
            c_n = f_g * c + i_g * g_g
            h_n = o_g * jnp.tanh(c_n)
            m = lens2 > t
            return ((jnp.where(m, h_n, h), jnp.where(m, c_n, c)),
                    jnp.where(m, h_n, 0.0))

        return step

    z = jnp.zeros((B, H), jnp.float32)
    fwd = make_step(raw["w_ih_f"], raw["w_hh_f"], raw["b_ih_f"] + raw["b_hh_f"])
    bwd = make_step(raw["w_ih_b"], raw["w_hh_b"], raw["b_ih_b"] + raw["b_hh_b"])
    _, out_f = lax.scan(fwd, (z, z), (x, jnp.arange(T)))
    _, out_b_rev = lax.scan(bwd, (z, z), (x[::-1], jnp.arange(T - 1, -1, -1)))
    return jnp.concatenate([out_f, out_b_rev[::-1]], axis=-1)


if __name__ == "__main__":
    key = jax.random.PRNGKey(0)
    k_p1, k_x1, k_p2, k_x2 = jax.random.split(key, 4)

    # Case 1: Din=16, Dout=64 (H=32), T=16, B=3, variable sentence lengths.
    Din, Dout, T, B = 16, 64, 16, 3
    lens = jnp.array([16, 9, 4], dtype=jnp.int32)
    raw = init_bilstm_params(k_p1, Din, Dout)
    kp = pack_bilstm_params(raw)
    x = jax.random.normal(k_x1, (T, B, Din), jnp.float32)

    out = jax.block_until_ready(bilstm_forward(x, lens, kp))
    ref = bilstm_reference(x, lens, raw)
    assert out.shape == (T, B, Dout)
    # bf16 MXU matmuls + bf16 gx storage (f32 accumulation / bias / state)
    # vs the pure-f32 reference.
    assert jnp.allclose(out, ref, atol=4e-2, rtol=0.0), "case 1 mismatch"

    # Case 2: T not a multiple of the time chunk (exercises time padding).
    Din2, Dout2, T2, B2 = 8, 32, 11, 2
    lens_2 = jnp.array([11, 5], dtype=jnp.int32)
    raw2 = init_bilstm_params(k_p2, Din2, Dout2)
    kp2 = pack_bilstm_params(raw2)
    x2 = jax.random.normal(k_x2, (T2, B2, Din2), jnp.float32)

    out_2 = jax.block_until_ready(bilstm_forward(x2, lens_2, kp2))
    ref_2 = bilstm_reference(x2, lens_2, raw2)
    assert out_2.shape == (T2, B2, Dout2)
    assert jnp.allclose(out_2, ref_2, atol=4e-2, rtol=0.0), "case 2 mismatch"

    print("KERNEL_OK")
</pallas_src>

<mosaic_0001>
module attributes {stable_mosaic.version = 11 : i64} {
  func.func @_inproj_kernel(%arg0: i32, %arg1: memref<16x8x16xbf16, #tpu.memory_space<vmem>>, %arg2: memref<2x16x128xbf16, #tpu.memory_space<vmem>>, %arg3: memref<2x16x8x128xbf16, #tpu.memory_space<vmem>>) attributes {dimension_semantics = [#tpu.dimension_semantics<parallel>], iteration_bounds = array<i64: 1>, scalar_prefetch = 0 : i64, scratch_operands = 0 : i64, tpu.core_type = #tpu.core_type<tc>, window_params = [{transform_indices = @transform_0, window_bounds = array<i64: 16, 8, 16>}, {pipeline_mode = #tpu.pipeline_mode<synchronous>, transform_indices = @transform_1, window_bounds = array<i64: 2, 16, 128>}, {transform_indices = @transform_2, window_bounds = array<i64: 2, 16, 8, 128>}]} {
    %c0 = arith.constant 0 : index
    %c0_0 = arith.constant 0 : index
    %c0_1 = arith.constant 0 : index
    %0 = vector.load %arg1[%c0, %c0_0, %c0_1] : memref<16x8x16xbf16, #tpu.memory_space<vmem>>, vector<16x8x16xbf16>
    %1 = vector.shape_cast %0 : vector<16x8x16xbf16> to vector<128x16xbf16>
    %c0_2 = arith.constant 0 : index
    %c0_3 = arith.constant 0 : index
    %c0_4 = arith.constant 0 : index
    %2 = vector.load %arg2[%c0_2, %c0_3, %c0_4] : memref<2x16x128xbf16, #tpu.memory_space<vmem>>, vector<1x16x128xbf16>
    %3 = vector.shape_cast %2 : vector<1x16x128xbf16> to vector<16x128xbf16>
    %cst = arith.constant dense<0.000000e+00> : vector<128x128xf32>
    %4 = tpu.matmul %1, %3, %cst {dimension_numbers = #tpu.dot_dimension_numbers<[1], [0], [0], [1], [0, 0, 1, 1], [], []>} : vector<128x16xbf16>, vector<16x128xbf16>, vector<128x128xf32> -> vector<128x128xf32>
    %c1 = arith.constant 1 : index
    %c0_5 = arith.constant 0 : index
    %c0_6 = arith.constant 0 : index
    %5 = vector.load %arg2[%c1, %c0_5, %c0_6] : memref<2x16x128xbf16, #tpu.memory_space<vmem>>, vector<1x16x128xbf16>
    %6 = vector.shape_cast %5 : vector<1x16x128xbf16> to vector<16x128xbf16>
    %cst_7 = arith.constant dense<0.000000e+00> : vector<128x128xf32>
    %7 = tpu.matmul %1, %6, %cst_7 {dimension_numbers = #tpu.dot_dimension_numbers<[1], [0], [0], [1], [0, 0, 1, 1], [], []>} : vector<128x16xbf16>, vector<16x128xbf16>, vector<128x128xf32> -> vector<128x128xf32>
    %8 = arith.truncf %4 : vector<128x128xf32> to vector<128x128xbf16>
    %9 = vector.shape_cast %8 : vector<128x128xbf16> to vector<16x8x128xbf16>
    %c0_8 = arith.constant 0 : index
    %c0_9 = arith.constant 0 : index
    %c0_10 = arith.constant 0 : index
    %c0_11 = arith.constant 0 : index
    %10 = vector.load %arg3[%c0_8, %c0_9, %c0_10, %c0_11] : memref<2x16x8x128xbf16, #tpu.memory_space<vmem>>, vector<1x16x8x128xbf16>
    %11 = vector.shape_cast %10 : vector<1x16x8x128xbf16> to vector<16x8x128xbf16>
    %12 = vector.shape_cast %9 : vector<16x8x128xbf16> to vector<1x16x8x128xbf16>
    tpu.vector_store %arg3[%c0_8, %c0_9, %c0_10, %c0_11], %12 {strides = array<i32>} : memref<2x16x8x128xbf16, #tpu.memory_space<vmem>>, vector<1x16x8x128xbf16>,
    %13 = arith.truncf %7 : vector<128x128xf32> to vector<128x128xbf16>
    %14 = vector.shape_cast %13 : vector<128x128xbf16> to vector<16x8x128xbf16>
    %c1_12 = arith.constant 1 : index
    %c0_13 = arith.constant 0 : index
    %c0_14 = arith.constant 0 : index
    %c0_15 = arith.constant 0 : index
    %15 = vector.load %arg3[%c1_12, %c0_13, %c0_14, %c0_15] : memref<2x16x8x128xbf16, #tpu.memory_space<vmem>>, vector<1x16x8x128xbf16>
    %16 = vector.shape_cast %15 : vector<1x16x8x128xbf16> to vector<16x8x128xbf16>
    %17 = vector.shape_cast %14 : vector<16x8x128xbf16> to vector<1x16x8x128xbf16>
    tpu.vector_store %arg3[%c1_12, %c0_13, %c0_14, %c0_15], %17 {strides = array<i32>} : memref<2x16x8x128xbf16, #tpu.memory_space<vmem>>, vector<1x16x8x128xbf16>,
    return
  }
  func.func @transform_0(%arg0: i32) -> (i32, i32, i32) {
    %c0_i32 = arith.constant 0 : i32
    %c0_i32_0 = arith.constant 0 : i32
    %c0_i32_1 = arith.constant 0 : i32
    return %arg0, %c0_i32, %c0_i32_0 : i32, i32, i32
  }
  func.func @transform_1(%arg0: i32) -> (i32, i32, i32) {
    %c0_i32 = arith.constant 0 : i32
    %c0_i32_0 = arith.constant 0 : i32
    %c0_i32_1 = arith.constant 0 : i32
    %c0_i32_2 = arith.constant 0 : i32
    return %c0_i32, %c0_i32_0, %c0_i32_1 : i32, i32, i32
  }
  func.func @transform_2(%arg0: i32) -> (i32, i32, i32, i32) {
    %c0_i32 = arith.constant 0 : i32
    %c0_i32_0 = arith.constant 0 : i32
    %c0_i32_1 = arith.constant 0 : i32
    %c0_i32_2 = arith.constant 0 : i32
    return %c0_i32, %arg0, %c0_i32_0, %c0_i32_1 : i32, i32, i32, i32
  }
}

</mosaic_0001>

<bundles_post_ra>
// kernel: tpu_custom_call.1
= control target key start
LH: loop header
LB: loop body
LE: loop exit
PB: predicated region body
PF: predicated region fallthrough
CT: control target
= control target key end

     0   :  { %7 = vsyncpa [#allocation3], 0  ;;  %s885_s0 = inlined_call_operand.hbm [shape: bf16[16,8,16], index: 0, kind: input, shape index: {}]   ;;  %s886_s1 = inlined_call_operand.hbm [shape: bf16[2,16,128], index: 1, kind: input, shape index: {}]   ;;  %s887_s2 = inlined_call_operand.hbm [shape: bf16[2,16,8,128], index: 2, kind: output, shape index: {}]  }
   0x1   :  { %8 = vsyncpa [#allocation6], 0 }
   0x2   :  { %9 = vsyncpa [#allocation4], 0  ;;  %s831_s9 = smov [#allocation2]  }
   0x3   :  { %s15_s10 = sshll.u32 %s831_s9, 4  ;;  %s16_s10 = int_to_ptr.vmem [resolvable:$true] %s15_s10 }
   0x4   :  { %s773_s11 = scalar_lea.vmem %s16_s10, 1024  ;;  %p778_p1 = scmp.lt.s32.totalorder %s16_s10, %s16_s10 }
   0x5   :  { %p774_p0 = scmp.ne.s32.totalorder %s16_s10, %s773_s11  ;;  %p779_p2 = scmp.lt.s32.totalorder %s773_s11, %s773_s11 }
   0x7   :  { %p780_p3 = por %p779_p2, %p778_p1 }
   0x9   :  { %p781_p4 = pnand %p780_p3, %p774_p0 }
   0xb   :  { %784 = shalt.err (!%p781_p4)
}
   0xc   :  { %s832_s12 = smov 64   ;;  %s833_s13 = smov 4  }
   0xd   :  { %21 = dma.hbm_to_vmem [thread:$0]  %s885_s0, 1024, %s16_s10, [#allocation3], %s832_s12, %s832_s12, %s833_s13  }
   0xe   :  { %s834_s16 = smov [#allocation5]  }
   0xf   :  { %s27_s17 = sshll.u32 %s834_s16, 4  ;;  %s28_s17 = int_to_ptr.vmem [resolvable:$true] %s27_s17 }
  0x10   :  { %s793_s18 = scalar_lea.vmem %s28_s17, 256  ;;  %p798_p6 = scmp.lt.s32.totalorder %s28_s17, %s28_s17 }
  0x11   :  { %p794_p5 = scmp.ne.s32.totalorder %s28_s17, %s793_s18  ;;  %p799_p7 = scmp.lt.s32.totalorder %s793_s18, %s793_s18 }
  0x13   :  { %p800_p8 = por %p799_p7, %p798_p6 }
  0x15   :  { %p801_p9 = pnand %p800_p8, %p794_p5 }
  0x17   :  { %804 = shalt.err (!%p801_p9)
}
  0x18   :  { %33 = dma.hbm_to_vmem [thread:$0]  %s886_s1, 256, %s28_s17, [#allocation6], %s832_s12, %s832_s12, %s833_s13  }
  0x19   :  { %825 = dma.done.wait [#allocation3], 1024  }
  0x1a   :  { %826 = vsyncadd [#allocation3], 4294966272 }
  0x1b   :  { %827 = dma.done.wait [#allocation6], 256  }
  0x1c   :  { %828 = vsyncadd [#allocation6], 4294967040  ;;  %v755_v0 = vld [vmem:[#allocation5] sm:$0xff]   ;;  %v756_v1 = vld [vmem:[#allocation5 + $0x8] sm:$0xff]   ;;  %vm105_vm0 = vcmask 130048   ;;  %s835_s0 = smov [#allocation7]  }
  0x1d   :  { %714 = vmatprep.subr.bf16.mxu0 %v755_v0  ;;  %v757_v2 = vld [vmem:[#allocation2] sm:$0xff]   ;;  %732 = vmatprep.subr.bf16.mxu1 %v756_v1  ;;  %v758_v3 = vld [vmem:[#allocation2 + $0x8] sm:$0xff]   ;;  %v759_v4 = vld [vmem:[#allocation2 + $0x10] sm:$0xff]   ;;  %s499_s1 = sshll.u32 %s835_s0, 4  ;;  %s500_s1 = int_to_ptr.vmem [resolvable:$true] %s499_s1 }
  0x1e   :  { %715 = vmatpush3.bf16.msra.mxu0 %v755_v0  ;;  %733 = vmatpush3.bf16.msra.mxu1 %v756_v1  ;;  %v760_v5 = vld [vmem:[#allocation2 + $0x18] sm:$0xff]   ;;  %v761_v6 = vld [vmem:[#allocation2 + $0x20] sm:$0xff]   ;;  %v762_v7 = vld [vmem:[#allocation2 + $0x28] sm:$0xff]   ;;  %s805_s21 = scalar_lea.vmem %s500_s1, 2048  ;;  %p810_p11 = scmp.lt.s32.totalorder %s500_s1, %s500_s1 }
  0x1f   :  { %716 = vmatprep.mubr.msk.bf16.mxu0 %vm105_vm0, %v757_v2  ;;  %734 = vmatprep.mubr.msk.bf16.mxu1 %vm105_vm0, %v757_v2  ;;  %v763_v8 = vld [vmem:[#allocation2 + $0x30] sm:$0xff]   ;;  %v764_v9 = vld [vmem:[#allocation2 + $0x38] sm:$0xff]   ;;  %p806_p10 = scmp.ne.s32.totalorder %s500_s1, %s805_s21  ;;  %p811_p12 = scmp.lt.s32.totalorder %s805_s21, %s805_s21 }
  0x21   :  { %717 = vmatmul.mubr.msk.bf16.vlgmr.msra.gmra.mxu0 %vm105_vm0, %v758_v3  ;;  %735 = vmatmul.mubr.msk.bf16.vlgmr.msra.gmra.mxu1 %vm105_vm0, %v758_v3  ;;  %p812_p13 = por %p811_p12, %p810_p11 }
  0x22   :  { %720 = vmatprep.mubr.msk.bf16.mxu0 %vm105_vm0, %v759_v4  ;;  %738 = vmatprep.mubr.msk.bf16.mxu1 %vm105_vm0, %v759_v4 }
  0x23   :  { %p813_p0 = pnand %p812_p13, %p806_p10 }
  0x29   :  { %721 = vmatmul.mubr.msk.bf16.gmra.mxu0 %vm105_vm0, %v760_v5  ;;  %739 = vmatmul.mubr.msk.bf16.gmra.mxu1 %vm105_vm0, %v760_v5 }
  0x2a   :  { %724 = vmatprep.mubr.msk.bf16.mxu0 %vm105_vm0, %v761_v6  ;;  %742 = vmatprep.mubr.msk.bf16.mxu1 %vm105_vm0, %v761_v6 }
  0x31   :  { %725 = vmatmul.mubr.msk.bf16.gmra.mxu0 %vm105_vm0, %v762_v7  ;;  %743 = vmatmul.mubr.msk.bf16.gmra.mxu1 %vm105_vm0, %v762_v7 }
  0x32   :  { %728 = vmatprep.mubr.msk.bf16.mxu0 %vm105_vm0, %v763_v8  ;;  %746 = vmatprep.mubr.msk.bf16.mxu1 %vm105_vm0, %v763_v8 }
  0x39   :  { %729 = vmatmul.mubr.msk.bf16.gmra.mxu0 %vm105_vm0, %v764_v9  ;;  %747 = vmatmul.mubr.msk.bf16.gmra.mxu1 %vm105_vm0, %v764_v9 }
  0xe1   :  { %v718_v10 = vpop.f32.mrf.mxu0  ;;  %v736_v11 = vpop.f32.mrf.mxu1 }
  0xe3   :  { %v164_v12 = vpop.f32.mrf.mxu0  ;;  %v270_v13 = vpop.f32.mrf.mxu1 }
  0xe5   :  { %v719_v14 = vpop.f32.mrf.mxu0  ;;  %v737_v16 = vpop.f32.mrf.mxu1 }
  0xe6   :  { %v610_v15 = vpack.c.bf16 %v719_v14, %v718_v10  ;;  %v650_v17 = vpack.c.bf16 %v737_v16, %v736_v11 }
  0xe7   :  { %v167_v18 = vpop.f32.mrf.mxu0  ;;  %v273_v20 = vpop.f32.mrf.mxu1 }
  0xe8   :  { %682 = vst [vmem:[#allocation7 + $0x8] sm:$0xff] %v610_v15   ;;  %v605_v19 = vpack.c.bf16 %v167_v18, %v164_v12  ;;  %689 = vst [vmem:[#allocation7 + $0x48] sm:$0xff] %v650_v17   ;;  %v645_v21 = vpack.c.bf16 %v273_v20, %v270_v13 }
  0xe9   :  { %v722_v22 = vpop.f32.mrf.mxu0  ;;  %v740_v23 = vpop.f32.mrf.mxu1 }
  0xea   :  { %606 = vst [vmem:[#allocation7] sm:$0xff] %v605_v19   ;;  %646 = vst [vmem:[#allocation7 + $0x40] sm:$0xff] %v645_v21  }
  0xeb   :  { %v180_v24 = vpop.f32.mrf.mxu0  ;;  %v286_v25 = vpop.f32.mrf.mxu1 }
  0xed   :  { %v723_v26 = vpop.f32.mrf.mxu0  ;;  %v741_v28 = vpop.f32.mrf.mxu1 }
  0xee   :  { %v620_v27 = vpack.c.bf16 %v723_v26, %v722_v22  ;;  %v660_v29 = vpack.c.bf16 %v741_v28, %v740_v23 }
  0xef   :  { %v183_v30 = vpop.f32.mrf.mxu0  ;;  %v289_v32 = vpop.f32.mrf.mxu1 }
  0xf0   :  { %684 = vst [vmem:[#allocation7 + $0x18] sm:$0xff] %v620_v27   ;;  %v615_v31 = vpack.c.bf16 %v183_v30, %v180_v24  ;;  %691 = vst [vmem:[#allocation7 + $0x58] sm:$0xff] %v660_v29   ;;  %v655_v33 = vpack.c.bf16 %v289_v32, %v286_v25 }
  0xf1   :  { %v726_v34 = vpop.f32.mrf.mxu0  ;;  %v744_v35 = vpop.f32.mrf.mxu1 }
  0xf2   :  { %683 = vst [vmem:[#allocation7 + $0x10] sm:$0xff] %v615_v31   ;;  %690 = vst [vmem:[#allocation7 + $0x50] sm:$0xff] %v655_v33  }
  0xf3   :  { %v196_v36 = vpop.f32.mrf.mxu0  ;;  %v302_v37 = vpop.f32.mrf.mxu1 }
  0xf5   :  { %v727_v38 = vpop.f32.mrf.mxu0  ;;  %v745_v40 = vpop.f32.mrf.mxu1 }
  0xf6   :  { %v630_v39 = vpack.c.bf16 %v727_v38, %v726_v34  ;;  %v670_v41 = vpack.c.bf16 %v745_v40, %v744_v35 }
  0xf7   :  { %v199_v42 = vpop.f32.mrf.mxu0  ;;  %v305_v44 = vpop.f32.mrf.mxu1 }
  0xf8   :  { %686 = vst [vmem:[#allocation7 + $0x28] sm:$0xff] %v630_v39   ;;  %v625_v43 = vpack.c.bf16 %v199_v42, %v196_v36  ;;  %693 = vst [vmem:[#allocation7 + $0x68] sm:$0xff] %v670_v41   ;;  %v665_v45 = vpack.c.bf16 %v305_v44, %v302_v37 }
  0xf9   :  { %v730_v46 = vpop.f32.mrf.mxu0  ;;  %v748_v47 = vpop.f32.mrf.mxu1 }
  0xfa   :  { %685 = vst [vmem:[#allocation7 + $0x20] sm:$0xff] %v625_v43   ;;  %692 = vst [vmem:[#allocation7 + $0x60] sm:$0xff] %v665_v45  }
  0xfb   :  { %v212_v48 = vpop.f32.mrf.mxu0  ;;  %v318_v49 = vpop.f32.mrf.mxu1 }
  0xfd   :  { %v731_v50 = vpop.f32.mrf.mxu0  ;;  %v749_v52 = vpop.f32.mrf.mxu1 }
  0xfe   :  { %v640_v51 = vpack.c.bf16 %v731_v50, %v730_v46  ;;  %v680_v53 = vpack.c.bf16 %v749_v52, %v748_v47 }
  0xff   :  { %v215_v54 = vpop.f32.mrf.mxu0  ;;  %v321_v56 = vpop.f32.mrf.mxu1 }
 0x100   :  { %688 = vst [vmem:[#allocation7 + $0x38] sm:$0xff] %v640_v51   ;;  %v635_v55 = vpack.c.bf16 %v215_v54, %v212_v48  ;;  %695 = vst [vmem:[#allocation7 + $0x78] sm:$0xff] %v680_v53   ;;  %v675_v57 = vpack.c.bf16 %v321_v56, %v318_v49 }
 0x102   :  { %687 = vst [vmem:[#allocation7 + $0x30] sm:$0xff] %v635_v55   ;;  %694 = vst [vmem:[#allocation7 + $0x70] sm:$0xff] %v675_v57  }
 0x103   :  { %816 = shalt.err (!%p813_p0)
}
 0x104   :  { %505 = dma.vmem_to_hbm [thread:$0]  %s500_s1, 2048, %s887_s2, [#allocation4], %s832_s12, %s832_s12, %s833_s13  }
 0x105   :  { %829 = dma.done.wait [#allocation4], 2048  }
 0x106   :  { %830 = vsyncadd [#allocation4], 4294965248 }
 0x107   :  { %509 = vsyncpa [#allocation3], 1 }
 0x108   :  { %510 = vsyncpa [#allocation6], 1 }
 0x109   :  { %511 = vsyncpa [#allocation4], 1 }

</bundles_post_ra>
